<compile_context>
chip_gen: v5e
topology: v5e:2x2
jax: 0.10.0
libtpu: 0.0.40
codegen_flags: <defaults>
</compile_context>

<pallas_src>
import math
from typing import NamedTuple, Optional

import jax
import jax.numpy as jnp
from jax.experimental import pallas as pl
from jax.experimental.pallas import tpu as pltpu


def _round_up(x, m):
    return ((x + m - 1) // m) * m


# ----------------------------------------------------------------------------
# Kernels
# ----------------------------------------------------------------------------

def _single_bias_kernel(x_ref, w_ref, b_ref, o_ref):
    """Whole K in one tile: write dot + bias straight to the output tile."""
    acc = jnp.dot(x_ref[...].astype(w_ref.dtype), w_ref[...],
                  preferred_element_type=jnp.float32)
    o_ref[...] = (acc + b_ref[...].astype(jnp.float32)).astype(o_ref.dtype)


def _single_nobias_kernel(x_ref, w_ref, o_ref):
    acc = jnp.dot(x_ref[...].astype(w_ref.dtype), w_ref[...],
                  preferred_element_type=jnp.float32)
    o_ref[...] = acc.astype(o_ref.dtype)


def _multi_bias_kernel(x_ref, w_ref, b_ref, o_ref, acc_ref):
    """K split over grid axis 2: f32 accumulator scratch, bias on last step."""
    k = pl.program_id(2)
    part = jnp.dot(x_ref[...].astype(w_ref.dtype), w_ref[...],
                   preferred_element_type=jnp.float32)

    @pl.when(k == 0)
    def _():
        acc_ref[...] = part          # store, not zero-init + add

    @pl.when(k != 0)
    def _():
        acc_ref[...] += part

    @pl.when(k == pl.num_programs(2) - 1)
    def _():
        o_ref[...] = (acc_ref[...] + b_ref[...].astype(jnp.float32)).astype(o_ref.dtype)


def _multi_nobias_kernel(x_ref, w_ref, o_ref, acc_ref):
    k = pl.program_id(2)
    part = jnp.dot(x_ref[...].astype(w_ref.dtype), w_ref[...],
                   preferred_element_type=jnp.float32)

    @pl.when(k == 0)
    def _():
        acc_ref[...] = part

    @pl.when(k != 0)
    def _():
        acc_ref[...] += part

    @pl.when(k == pl.num_programs(2) - 1)
    def _():
        o_ref[...] = acc_ref[...].astype(o_ref.dtype)


# ----------------------------------------------------------------------------
# Tiling heuristics
# ----------------------------------------------------------------------------

def _vmem_caps():
    """(tile-selection budget, vmem_limit_bytes cap) per TPU generation."""
    cap = None
    try:
        cap = int(pltpu.get_tpu_info().vmem_capacity_bytes)
    except Exception:
        cap = None
    if cap is None or cap <= (64 << 20):
        limit = 48 << 20       # v7x (64 MiB physical) or unknown: stay conservative
    else:
        limit = 100 << 20      # v5e / v6e (128 MiB)
    return (limit * 3) // 4, limit


def _vmem_bytes(tm, tn, tk, x_dsize, w_dsize, out_dsize, multi_k):
    b = 2 * tm * tk * x_dsize        # double-buffered x tile
    b += 2 * tk * tn * w_dsize       # double-buffered weight tile
    b += 2 * tm * tn * out_dsize     # double-buffered output tile
    b += 2 * tn * 4                  # bias tile (upper bound)
    if multi_k:
        b += tm * tn * 4             # f32 accumulator scratch
    return b


_TM_CAP = 512                        # larger tm => fewer weight re-streams


def _select_nk_tiles(N, K, x_dsize, w_dsize, out_dsize, budget):
    """Pick (tn, tk) from the weight side only (M-independent, so the weight
    can be padded once at prepare time).  tk prefers whole K (single K step
    => x never re-DMA'd across the N sweep)."""
    tn = min(512, _round_up(N, 128))
    tk = _round_up(K, 128)

    def over(tn_, tk_):
        return _vmem_bytes(_TM_CAP, tn_, tk_, x_dsize, w_dsize, out_dsize, True) > budget

    while over(tn, tk) and tk > 512 and (tk // 2) % 128 == 0:
        tk //= 2
    while over(tn, tk) and tn > 256 and (tn // 2) % 128 == 0:
        tn //= 2
    return tn, tk


# ----------------------------------------------------------------------------
# Parameter preparation (one-time: transpose + cast + pad the weight)
# ----------------------------------------------------------------------------

class LinearParams(NamedTuple):
    weight_t: jax.Array              # (K_pad, N_pad), operand dtype, transposed
    bias: Optional[jax.Array]        # (1, N_pad) or None
    input_dim: int
    output_dim: int
    tn: int
    tk: int


def prepare_linear(weight, bias=None, *, operand_dtype=None, tn=None, tk=None):
    """One-time prep of a PyTorch-layout (out_dim, in_dim) weight.

    Transposes to (K, N), casts to the MXU operand dtype (default bf16 when
    the weight is f32) and pads to tile multiples.  Do this once at parameter
    load; the per-call path only pads x.
    """
    N, K = weight.shape
    if operand_dtype is None:
        if weight.dtype in (jnp.float32, jnp.float64):
            operand_dtype = jnp.bfloat16
        else:
            operand_dtype = weight.dtype
    w_dsize = jnp.dtype(operand_dtype).itemsize

    budget, _ = _vmem_caps()
    auto_tn, auto_tk = _select_nk_tiles(N, K, 4, w_dsize, 4, budget)
    tn = tn or auto_tn
    tk = tk or auto_tk

    N_pad = _round_up(N, tn)
    K_pad = _round_up(K, tk)

    w_t = weight.astype(operand_dtype).T            # (K, N)
    if (K_pad, N_pad) != (K, N):
        w_t = jnp.pad(w_t, ((0, K_pad - K), (0, N_pad - N)))

    b = None
    if bias is not None:
        b = bias
        if N_pad != N:
            b = jnp.pad(b, ((0, N_pad - N),))
        b = b.reshape(1, N_pad)

    return LinearParams(weight_t=w_t, bias=b, input_dim=K, output_dim=N,
                        tn=tn, tk=tk)


# ----------------------------------------------------------------------------
# Forward pass
# ----------------------------------------------------------------------------

def linear_pallas(x, weight, bias=None, *, operand_dtype=None,
                  tm=None, tn=None, tk=None):
    """Equivalent of torch.nn.functional.linear(x, weight, bias).

    `weight` may be either a raw PyTorch-layout (out_dim, in_dim) array (it
    will be prepared on the fly -- prefer calling prepare_linear() once) or a
    LinearParams produced by prepare_linear().
    """
    if isinstance(weight, LinearParams):
        if bias is not None:
            raise ValueError("bias is baked into LinearParams; pass bias=None")
        params = weight
    else:
        params = prepare_linear(weight, bias, operand_dtype=operand_dtype,
                                tn=tn, tk=tk)
    return _linear_apply(x, params, tm=tm)


def _linear_apply(x, params, *, tm=None):
    *lead, K = x.shape
    if K != params.input_dim:
        raise ValueError(f"input_dim mismatch: x has {K}, weight has {params.input_dim}")
    N = params.output_dim
    w_t = params.weight_t
    K_pad, N_pad = w_t.shape
    tn, tk = params.tn, params.tk

    M = math.prod(lead) if lead else 1
    out_dtype = x.dtype
    x_dsize = jnp.dtype(x.dtype).itemsize
    w_dsize = jnp.dtype(w_t.dtype).itemsize
    out_dsize = jnp.dtype(out_dtype).itemsize

    # Sublane alignment follows the packed-vreg tile of the x operand.
    m_align = {4: 8, 2: 16, 1: 32}.get(x_dsize, 8)
    budget, vmem_cap = _vmem_caps()

    if tm is None:
        tm = min(_TM_CAP, _round_up(M, m_align))
        while (_vmem_bytes(tm, tn, tk, x_dsize, w_dsize, out_dsize, tk < K_pad) > budget
               and tm > m_align):
            tm = max(m_align, tm // 2)
    M_pad = _round_up(M, tm)

    # Guarantee >=2 blocks on a parallel axis when possible (v7x has 2 TCs;
    # a (1,1,k) grid would idle one of them).
    if M_pad // tm == 1 and N_pad // tn == 1:
        if tn % 256 == 0:
            tn //= 2
        elif tm > m_align and M > m_align:
            tm = max(m_align, _round_up((M + 1) // 2, m_align))
            M_pad = _round_up(M, tm)

    # Per-call padding touches x only; the weight was padded at prepare time.
    x2d = x.reshape(M, K)
    if (M_pad, K_pad) != (M, K):
        x2d = jnp.pad(x2d, ((0, M_pad - M), (0, K_pad - K)))

    gm, gn, gk = M_pad // tm, N_pad // tn, K_pad // tk
    has_bias = params.bias is not None

    if gk == 1:
        # Single K step: no accumulator scratch, 2-D all-parallel grid.
        in_specs = [
            pl.BlockSpec((tm, tk), lambda i, j: (i, 0)),   # x tile (re-used across j)
            pl.BlockSpec((tk, tn), lambda i, j: (0, j)),   # weight tile (K, N)
        ]
        operands = [x2d, w_t]
        if has_bias:
            in_specs.append(pl.BlockSpec((1, tn), lambda i, j: (0, j)))
            operands.append(params.bias)
            kernel = _single_bias_kernel
        else:
            kernel = _single_nobias_kernel
        grid = (gm, gn)
        out_spec = pl.BlockSpec((tm, tn), lambda i, j: (i, j))
        scratch = []
        dims = ("parallel", "parallel")
    else:
        in_specs = [
            pl.BlockSpec((tm, tk), lambda i, j, k: (i, k)),
            pl.BlockSpec((tk, tn), lambda i, j, k: (k, j)),
        ]
        operands = [x2d, w_t]
        if has_bias:
            in_specs.append(pl.BlockSpec((1, tn), lambda i, j, k: (0, j)))
            operands.append(params.bias)
            kernel = _multi_bias_kernel
        else:
            kernel = _multi_nobias_kernel
        grid = (gm, gn, gk)
        out_spec = pl.BlockSpec((tm, tn), lambda i, j, k: (i, j))
        scratch = [pltpu.VMEM((tm, tn), jnp.float32)]
        dims = ("parallel", "parallel", "arbitrary")

    needed = _vmem_bytes(tm, tn, tk, x_dsize, w_dsize, out_dsize, gk > 1)
    vmem_limit = min(vmem_cap, max(32 << 20, int(needed * 1.25)))

    # Bytes actually moved, including re-streaming across grid blocks:
    # weight is re-read once per M block; x once per N block (unless gk == 1,
    # where its block index is constant across the j sweep).
    x_restream = 1 if gk == 1 else gn
    cost = pl.CostEstimate(
        flops=2 * M_pad * N_pad * K_pad,
        transcendentals=0,
        bytes_accessed=(N_pad * K_pad * w_dsize * gm
                        + M_pad * K_pad * x_dsize * x_restream
                        + M_pad * N_pad * out_dsize
                        + (N_pad * 4 if has_bias else 0)),
    )

    out2d = pl.pallas_call(
        kernel,
        out_shape=jax.ShapeDtypeStruct((M_pad, N_pad), out_dtype),
        grid_spec=pltpu.PrefetchScalarGridSpec(
            num_scalar_prefetch=0,
            grid=grid,
            in_specs=in_specs,
            out_specs=out_spec,
            scratch_shapes=scratch,
        ),
        compiler_params=pltpu.CompilerParams(
            dimension_semantics=dims,
            vmem_limit_bytes=vmem_limit,
        ),
        cost_estimate=cost,
    )(*operands)

    out2d = out2d[:M, :N]
    return out2d.reshape(*lead, N)


# ----------------------------------------------------------------------------
# Parameter init (matches fairseq2 _init_uniform)
# ----------------------------------------------------------------------------

def init_linear_params(key, input_dim, output_dim, use_bias, dtype=jnp.float32):
    """kaiming_uniform_(a=sqrt(5)) on a 2-D weight == U(-1/sqrt(fan_in),
    1/sqrt(fan_in)); bias uses the same bound."""
    k_w, k_b = jax.random.split(key)
    bound = 1.0 / math.sqrt(input_dim) if input_dim > 0 else 0.0
    weight = jax.random.uniform(
        k_w, (output_dim, input_dim), dtype=dtype, minval=-bound, maxval=bound
    )
    bias = None
    if use_bias:
        bias = jax.random.uniform(
            k_b, (output_dim,), dtype=dtype, minval=-bound, maxval=bound
        )
    return weight, bias


if __name__ == "__main__":
    key = jax.random.PRNGKey(0)
    k1, k2, k3, k4 = jax.random.split(key, 4)

    # 1) Small (*, input_dim) -> (*, output_dim), bias, exact-f32 escape hatch.
    batch, seq, input_dim, output_dim = 2, 8, 32, 64
    x = jax.random.normal(k1, (batch, seq, input_dim), dtype=jnp.float32)
    weight, bias = init_linear_params(k2, input_dim, output_dim, use_bias=True)

    y = jax.block_until_ready(
        linear_pallas(x, weight, bias, operand_dtype=jnp.float32))
    y_ref = jnp.einsum("bsk,nk->bsn", x, weight) + bias
    assert y.shape == (batch, seq, output_dim)
    assert jnp.allclose(y, y_ref, atol=1e-5, rtol=1e-5)

    # 1b) Same weights via the one-time prepared path (default bf16 operands),
    # reused for a different leading shape; looser tolerance for bf16 MXU.
    params = prepare_linear(weight, bias)
    y_bf = jax.block_until_ready(linear_pallas(x, params))
    assert y_bf.shape == (batch, seq, output_dim)
    assert jnp.allclose(y_bf, y_ref, atol=2e-2, rtol=2e-2)
    x_dec = jax.random.normal(k1, (3, input_dim), dtype=jnp.float32)
    y_dec = jax.block_until_ready(linear_pallas(x_dec, params))
    y_dec_ref = x_dec @ weight.T + bias
    assert y_dec.shape == (3, output_dim)
    assert jnp.allclose(y_dec, y_dec_ref, atol=2e-2, rtol=2e-2)

    # 2) Non-tile-multiple shape, no bias, forced multi-K-step accumulator
    #    kernel (tk=128 over K=384), default bf16 operands.
    M2, K2, N2 = 300, 384, 320
    x2 = jax.random.normal(k3, (M2, K2), dtype=jnp.float32)
    w2, _ = init_linear_params(k4, K2, N2, use_bias=False)
    params2 = prepare_linear(w2, None, tk=128)
    y2 = jax.block_until_ready(linear_pallas(x2, params2))
    y2_ref = x2 @ w2.T
    assert y2.shape == (M2, N2)
    assert jnp.allclose(y2, y2_ref, atol=2e-2, rtol=2e-2)

    print("KERNEL_OK")
</pallas_src>

<mosaic_0001>
module attributes {stable_mosaic.version = 11 : i64} {
  func.func @_single_bias_kernel(%arg0: i32, %arg1: i32, %arg2: memref<8x128xf32, #tpu.memory_space<vmem>>, %arg3: memref<128x128xf32, #tpu.memory_space<vmem>>, %arg4: memref<1x128xf32, #tpu.memory_space<vmem>>, %arg5: memref<8x128xf32, #tpu.memory_space<vmem>>) attributes {dimension_semantics = [#tpu.dimension_semantics<parallel>, #tpu.dimension_semantics<parallel>], iteration_bounds = array<i64: 2, 1>, scalar_prefetch = 0 : i64, scratch_operands = 0 : i64, tpu.core_type = #tpu.core_type<tc>, window_params = [{transform_indices = @transform_0, window_bounds = array<i64: 8, 128>}, {transform_indices = @transform_1, window_bounds = array<i64: 128, 128>}, {transform_indices = @transform_2, window_bounds = array<i64: 1, 128>}, {transform_indices = @transform_3, window_bounds = array<i64: 8, 128>}]} {
    %c0 = arith.constant 0 : index
    %c0_0 = arith.constant 0 : index
    %0 = vector.load %arg2[%c0, %c0_0] : memref<8x128xf32, #tpu.memory_space<vmem>>, vector<8x128xf32>
    %c0_1 = arith.constant 0 : index
    %c0_2 = arith.constant 0 : index
    %1 = vector.load %arg3[%c0_1, %c0_2] : memref<128x128xf32, #tpu.memory_space<vmem>>, vector<128x128xf32>
    %cst = arith.constant dense<0.000000e+00> : vector<8x128xf32>
    %2 = tpu.matmul %0, %1, %cst {dimension_numbers = #tpu.dot_dimension_numbers<[1], [0], [0], [1], [0, 0, 1, 1], [], []>} : vector<8x128xf32>, vector<128x128xf32>, vector<8x128xf32> -> vector<8x128xf32>
    %c0_3 = arith.constant 0 : index
    %c0_4 = arith.constant 0 : index
    %3 = vector.load %arg4[%c0_3, %c0_4] : memref<1x128xf32, #tpu.memory_space<vmem>>, vector<1x128xf32>
    %4 = vector.broadcast %3 : vector<1x128xf32> to vector<8x128xf32>
    %5 = arith.addf %2, %4 : vector<8x128xf32>
    %c0_5 = arith.constant 0 : index
    %c0_6 = arith.constant 0 : index
    %6 = vector.load %arg5[%c0_5, %c0_6] : memref<8x128xf32, #tpu.memory_space<vmem>>, vector<8x128xf32>
    tpu.vector_store %arg5[%c0_5, %c0_6], %5 {strides = array<i32>} : memref<8x128xf32, #tpu.memory_space<vmem>>, vector<8x128xf32>,
    return
  }
  func.func @transform_0(%arg0: i32, %arg1: i32) -> (i32, i32) {
    %c0_i32 = arith.constant 0 : i32
    %c0_i32_0 = arith.constant 0 : i32
    return %arg0, %c0_i32 : i32, i32
  }
  func.func @transform_1(%arg0: i32, %arg1: i32) -> (i32, i32) {
    %c0_i32 = arith.constant 0 : i32
    %c0_i32_0 = arith.constant 0 : i32
    return %c0_i32, %arg1 : i32, i32
  }
  func.func @transform_2(%arg0: i32, %arg1: i32) -> (i32, i32) {
    %c0_i32 = arith.constant 0 : i32
    %c0_i32_0 = arith.constant 0 : i32
    return %c0_i32, %arg1 : i32, i32
  }
  func.func @transform_3(%arg0: i32, %arg1: i32) -> (i32, i32) {
    %c0_i32 = arith.constant 0 : i32
    return %arg0, %arg1 : i32, i32
  }
}

</mosaic_0001>

<bundles_post_ra>
// kernel: tpu_custom_call.1
= control target key start
LH: loop header
LB: loop body
LE: loop exit
PB: predicated region body
PF: predicated region fallthrough
CT: control target
= control target key end

     0   :  { %8 = vsyncpa [#allocation3], 0  ;;  %s818_s0 = inlined_call_operand.hbm [shape: f32[16,128], index: 0, kind: input, shape index: {}]   ;;  %s819_s1 = inlined_call_operand.hbm [shape: f32[128,128], index: 1, kind: input, shape index: {}]   ;;  %s820_s2 = inlined_call_operand.vmem [shape: f32[1,128], index: 2, kind: input, shape index: {}]   ;;  %s821_s3 = inlined_call_operand.hbm [shape: f32[16,128], index: 3, kind: output, shape index: {}]  }
   0x1   :  { %10 = vsyncpa [#allocation3 + $0x1], 0 }
   0x2   :  { %11 = vsyncpa [#allocation6], 0 }
   0x3   :  { %12 = vsyncpa [#allocation4], 0 }
   0x4   :  { %14 = vsyncpa [#allocation4 + $0x1], 0  ;;  %s665_s12 = smov 0   ;;  %s667_s13 = smov 0  }
   0x5   :  { %s669_s14 = smov 0   ;;  %s671_s15 = smov 0  }
   0x6   :  { %s673_s16 = smov 0   ;;  %s675_s17 = smov 0  }
   0x7 LB: > { %s402_s18 = sadd.s32 4294967295, %s640_s17   ;;  %p404_p0 = scmp.ge.s32.totalorder %s640_s17, 1  ;;  %s640_s17 = sphi %s675_s17, %s20_s17   ;;  %s636_s16 = sphi %s673_s16, %s832_s16   ;;  %s632_s15 = sphi %s671_s15, %s831_s15   ;;  %s628_s14 = sphi %s669_s14, %s830_s14   ;;  %s624_s13 = sphi %s667_s13, %s829_s13   ;;  %s620_s12 = sphi %s665_s12, %s828_s12  }
   0x8   : > { %p697_p1 = scmp.eq.s32.totalorder %s402_s18, 0  ;;  %p143_p2 = scmp.lt.s32.totalorder %s640_s17, 3 }
   0x9   : > { %s156_s22 = sshll.u32 %s819_s1, 4  ;;  %s642_s24 = smov [#allocation5]   ;;  %s157_s22 = int_to_ptr.hbm [resolvable:$true] %s156_s22 }
   0xa   : > { %p705_p3 = pnand %p404_p0, %p143_p2  ;;  %s158_s25 = sshll.u32 %s642_s24, 4  ;;  %s159_s25 = int_to_ptr.vmem [resolvable:$true] %s158_s25 }
   0xb   : > { %p407_p6 = scmp.ge.s32.totalorder %s640_s17, 2  ;;  %s643_s26 = smov 128  }
   0xc   : > { %p426_p4 = pneg %p705_p3  ;;  %s644_s27 = smov 8  }
   0xd   : > { %s403_s28 = sadd.s32 4294967294, %s640_s17   ;;  %s32_s29 = sadd.s32 1, %s636_s16 }
   0xe   : > { %p427_p5 = pnand %p426_p4, %p697_p1  ;;  %s39_s30 = sadd.s32 1, %s628_s14 }
   0xf   : > { %p34_p7 = scmp.ge.s32.totalorder %s32_s29, 2  ;;  %p46_p8 = scmp.ne.s32.totalorder %s628_s14, %s624_s13 }
  0x10   : > { %429 = dma.hbm_to_vmem [thread:$0]  (!%p427_p5), %s157_s22, 2048, %s159_s25, [#allocation6], %s643_s26, %s643_s26, %s644_s27  }
  0x11   : > { %p47_p9 = scmp.eq.s32.totalorder %s640_s17, 0  ;;  %p52_p10 = scmp.ne.s32.totalorder %s624_s13, %s620_s12 }
  0x12   : > { %s834_s29 = smov (%p34_p7, %s32_s29), 0  ;;  %p130_p13 = scmp.eq.s32.totalorder %s402_s18, 1 }
  0x13   : > { %p724_p11 = por %p47_p9, %p46_p8  ;;  %p730_p12 = por %p697_p1, %p52_p10 }
  0x14   : > { %s36_s6 = ssub.s32 %s636_s16, %s834_s29  ;;  %p136_p2 = scmp.eq.s32.totalorder %s403_s28, 1 }
  0x15   : > { %p37_p0 = scmp.eq.s32.totalorder %s36_s6, 0  ;;  %p736_p4 = por %p130_p13, %p46_p8 }
  0x16   : > { %p439_p5 = scmp.lt.s32.totalorder %s640_s17, 2  ;;  %p744_p7 = por %p136_p2, %p52_p10 }
  0x17   : > { %s742_s8 = scalar_select %p37_p0, %s628_s14, %s39_s30  }
  0x18   : > { %s178_s10 = sand.u32 1, %s628_s14   ;;  %s409_s20 = sshll.u32 %s636_s16, 3 }
  0x19   : > { %s408_s11 = sshll.u32 %s178_s10, 3  ;;  %s186_s18 = scalar_lea.hbm %s818_s0, %s409_s20 }
  0x1a   : > { %s182_s24 = scalar_lea.vmem [#allocation2], %s408_s11  ;;  %s188_s26 = sshll.u32 %s186_s18, 4  ;;  %s189_s26 = int_to_ptr.hbm [resolvable:$true] %s188_s26 }
  0x1b   : > { %s190_s25 = sshll.u32 %s182_s24, 4  ;;  %p431_p8 = pnand %p439_p5, %p724_p11  ;;  %s191_s25 = int_to_ptr.vmem [resolvable:$true] %s190_s25 }
  0x1c   : > { %s179_s27 = scalar_lea.sflag [#allocation3], %s178_s10  ;;  %199 = sbr.rel (%p705_p3) target bundleno = 199 (0xc7), region = 32 }
  0x1d   : > { %433 = dma.hbm_to_vmem [thread:$0]  (!%p431_p8), %s189_s26, 128, %s191_s25, %s179_s27  }
  0x1e   : > { %s758_s28 = sand.u32 (!%p705_p3), 1, %s624_s13  }
  0x1f   : > { %s411_s30 = sshll.u32 (!%p705_p3), %s758_s28, 3  ;;  %s202_s6 = scalar_lea.sflag (!%p705_p3), [#allocation3], %s758_s28 }
  0x20   : > { %s764_s11 = scalar_lea.vmem (!%p705_p3), [#allocation2], %s411_s30 }
  0x21   : > { %607 = dma.done.wait (%p730_p12), %s202_s6, 128  }
  0x22   : > { %609 = vsyncadd (%p730_p12), %s202_s6, 4294967168 }
  0x23   : > { %611 = dma.done.wait (%p697_p1), [#allocation6], 2048  }
  0x24   : > { %613 = vsyncadd (%p697_p1), [#allocation6], 4294965248  ;;  %v256_v0 = vld [vmem:[#allocation5 + $0x78] sm:$0xff]  ;;  %v255_v1 = vld [vmem:[#allocation5 + $0x70] sm:$0xff]  ;;  %s415_s19 = sshll.u32 %s632_s15, 3  ;;  %s236_s21 = scalar_lea.vmem [#allocation7], %s411_s30 }
  0x25   : > { %261 = vmatpush.msra.mxu0 %v256_v0  ;;  %v254_v2 = vld [vmem:[#allocation5 + $0x68] sm:$0xff]  ;;  %v253_v3 = vld [vmem:[#allocation5 + $0x60] sm:$0xff]  ;;  %v252_v4 = vld [vmem:[#allocation5 + $0x58] sm:$0xff]  ;;  %s294_s5 = scalar_lea.hbm %s821_s3, %s415_s19  ;;  %s296_s22 = sshll.u32 %s236_s21, 4  ;;  %s297_s22 = int_to_ptr.vmem [resolvable:$true] %s296_s22 }
  0x26   : > { %v251_v5 = vld [vmem:[#allocation5 + $0x50] sm:$0xff]  ;;  %v250_v6 = vld [vmem:[#allocation5 + $0x48] sm:$0xff]  ;;  %v249_v7 = vld [vmem:[#allocation5 + $0x40] sm:$0xff]  ;;  %s298_s18 = sshll.u32 %s294_s5, 4  ;;  %s283_s24 = scalar_lea.sflag [#allocation4], %s758_s28  ;;  %s299_s18 = int_to_ptr.hbm [resolvable:$true] %s298_s18 }
  0x27   : > { %262 = vmatpush.msra.mxu0 %v255_v1  ;;  %v248_v8 = vld [vmem:[#allocation5 + $0x38] sm:$0xff]  ;;  %v247_v9 = vld [vmem:[#allocation5 + $0x30] sm:$0xff]  ;;  %v246_v10 = vld [vmem:[#allocation5 + $0x28] sm:$0xff]  ;;  %s568_s15 = sshra.s32 %s299_s18, 4  ;;  %s574_s6 = scalar_lea.hbm %s821_s3, 16  ;;  %s569_s15 = int_to_ptr.hbm [resolvable:$true] %s568_s15 }
  0x28   : > { %v245_v11 = vld [vmem:[#allocation5 + $0x20] sm:$0xff]  ;;  %v244_v12 = vld [vmem:[#allocation5 + $0x18] sm:$0xff]  ;;  %v243_v13 = vld [vmem:[#allocation5 + $0x10] sm:$0xff]  ;;  %s570_s25 = scalar_lea.hbm %s569_s15, 8  ;;  %p575_p10 = scmp.lt.s32.totalorder %s569_s15, %s821_s3 }
  0x29   : > { %263 = vmatpush.msra.mxu0 %v254_v2  ;;  %v242_v14 = vld [vmem:[#allocation5 + $0x8] sm:$0xff]  ;;  %v241_v15 = vld [vmem:[#allocation5] sm:$0xff]  ;;  %v240_v16 = vld [vmem:[%s764_s11] sm:$0xff]  ;;  %p571_p1 = scmp.ne.s32.totalorder %s569_s15, %s570_s25  ;;  %p576_p11 = scmp.lt.s32.totalorder %s574_s6, %s570_s25 }
  0x2a   : > { %v493_v17 = vld [vmem:[%s820_s2] ss:$0 sm:$0xff] }
  0x2b   : > { %264 = vmatpush.msra.mxu0 %v253_v3  ;;  %p572_p3 = pnand %p571_p1, %p736_p4  ;;  %p577_p12 = por %p576_p11, %p575_p10 }
  0x2d   : > { %265 = vmatpush.msra.mxu0 %v252_v4  ;;  %p573_p9 = pneg %p572_p3 }
  0x2f   : > { %266 = vmatpush.msra.mxu0 %v251_v5  ;;  %p578_p13 = pnand %p577_p12, %p573_p9 }
  0x31   : > { %267 = vmatpush.msra.mxu0 %v250_v6 }
  0x33   : > { %268 = vmatpush.msra.mxu0 %v249_v7 }
  0x35   : > { %269 = vmatpush.msra.mxu0 %v248_v8 }
  0x37   : > { %270 = vmatpush.msra.mxu0 %v247_v9 }
  0x39   : > { %271 = vmatpush.msra.mxu0 %v246_v10 }
  0x3b   : > { %272 = vmatpush.msra.mxu0 %v245_v11 }
  0x3d   : > { %273 = vmatpush.msra.mxu0 %v244_v12 }
  0x3f   : > { %274 = vmatpush.msra.mxu0 %v243_v13 }
  0x41   : > { %275 = vmatpush.msra.mxu0 %v242_v14 }
  0x43   : > { %276 = vmatpush.msra.mxu0 %v241_v15 }
  0x44   : > { %277 = vmatmul.f32.vlgmr.msra.gmra.mxu0 %v240_v16 }
  0xc1   : > { %v278_v18 = vpop.f32.mrf.mxu0 }
  0xc2   : > { %v279_v19 = vadd.f32 %v493_v17, %v278_v18 }
  0xc4   : > { %281 = vst [vmem:[%s236_s21] sm:$0xff] %v279_v19 }
  0xc5   : > { %581 = shalt.err (!%p578_p13)
}
  0xc6   : > { %424 = dma.vmem_to_hbm [thread:$0]  (%p736_p4), %s297_s22, 128, %s299_s18, %s283_s24  }
  0xc7 PF: > { %s310_s28 = sand.u32 1, %s620_s12   ;;  %p435_p0 = pnand %p407_p6, %p744_p7 }
  0xc8   : > { %s311_s19 = scalar_lea.sflag [#allocation4], %s310_s28 }
  0xc9   : > { %p436_p2 = pneg %p435_p0 }
  0xcb   : > { %615 = dma.done.wait (%p436_p2), %s311_s19, 128  }
  0xcc   : > { %617 = vsyncadd (%p436_p2), %s311_s19, 4294967168  ;;  %s20_s17 = sadd.s32 1, %s640_s17   ;;  %s828_s12 = smov %s624_s13 }
  0xcd   : > { %p17_p5 = scmp.ge.s32.totalorder %s20_s17, 4   ;;  %s829_s13 = smov %s628_s14 }
  0xce   : > { %s830_s14 = smov %s742_s8  ;;  %s831_s15 = smov %s636_s16 }
  0xcf   : > { %s832_s16 = smov %s834_s29  ;;  %19 = sbr.rel (!%p17_p5) target bundleno = 7 (0x7), region = 85 }
  0xd4   :  { %317 = vsyncpa [#allocation3], 1 }
  0xd5   :  { %319 = vsyncpa [#allocation3 + $0x1], 1 }
  0xd6   :  { %320 = vsyncpa [#allocation6], 1 }
  0xd7   :  { %321 = vsyncpa [#allocation4], 1 }
  0xd8   :  { %323 = vsyncpa [#allocation4 + $0x1], 1 }

</bundles_post_ra>
